<compile_context>
chip_gen: v5e
topology: v5e:2x2
jax: 0.10.0
libtpu: 0.0.40
codegen_flags: <defaults>
</compile_context>

<pallas_src>
import functools

import jax
import jax.numpy as jnp
from jax import lax
from jax.experimental import pallas as pl
from jax.experimental.pallas import tpu as pltpu

LANE = 128
SUBLANE = 8


def _cdiv(a, b):
    return -(-a // b)


def _round_up(a, b):
    return _cdiv(a, b) * b


# ------------------------------ Pallas kernels ------------------------------ #

def _conv_stats_kernel(a_ref, w_ref, y_ref, stats_ref):
    """One MXU matmul per row tile (taps folded into K) + fused BN partials.

    a_ref:     (tm, K)     bf16  im2col rows (K = kh*kw*cin)
    w_ref:     (K, Cp)     bf16  taps-major weight (Cp = Cout padded to 128)
    y_ref:     (tm, Cp)    bf16  conv output tile
    stats_ref: (1, 8, Cp)  f32   rows 0/1 = per-tile [sum, sum_sq] (rest zero)
    """
    acc = jnp.dot(a_ref[...], w_ref[...], preferred_element_type=jnp.float32)
    y_ref[...] = acc.astype(y_ref.dtype)

    cp = acc.shape[-1]
    s1 = jnp.broadcast_to(jnp.sum(acc, axis=0, keepdims=True), (8, cp))
    s2 = jnp.broadcast_to(jnp.sum(acc * acc, axis=0, keepdims=True), (8, cp))
    row = lax.broadcasted_iota(jnp.int32, (8, cp), 0)
    # (8, Cp) block -> unmasked stores (review: pad stats to 8 sublanes).
    stats_ref[0] = jnp.where(row == 0, s1, jnp.where(row == 1, s2, 0.0))


def _bn_prelu_kernel(y_ref, scale_ref, shift_ref, alpha_ref, o_ref):
    """Fused BatchNorm (precomputed per-channel scale/shift) + per-channel PReLU.

    Arithmetic kept in f32 (v5e has no bf16 VPU); tile I/O is bf16.
    """
    t = y_ref[...].astype(jnp.float32) * scale_ref[...] + shift_ref[...]
    o_ref[...] = jnp.where(t >= 0.0, t, t * alpha_ref[...]).astype(o_ref.dtype)


# --------------------------------- wrappers --------------------------------- #

def prepare_params(params, out_ch):
    """One-time weight / affine re-layout (hoisted out of the per-step forward).

    conv_w (O,I,kh,kw) -> (kh*kw*I, Cp) bf16 taps-major, Cout zero-padded to a
    multiple of 128 (lane-dense MXU N dim); BN & PReLU vectors -> (1, Cp) f32.
    """
    w = params["conv_w"]
    o, cin, kh, kw = w.shape
    assert o == out_ch, (o, out_ch)
    cp = _round_up(out_ch, LANE)
    w2 = jnp.transpose(w, (2, 3, 1, 0)).reshape(kh * kw * cin, o)  # c fastest
    w2 = jnp.pad(w2, ((0, 0), (0, cp - o))).astype(jnp.bfloat16)

    def _padc(v, fill):
        v = v.astype(jnp.float32)
        return jnp.pad(v, (0, cp - out_ch), constant_values=fill).reshape(1, cp)

    return {
        "w2": w2,
        "gamma": _padc(params["bn_gamma"], 1.0),
        "beta": _padc(params["bn_beta"], 0.0),
        "alpha": _padc(params["prelu_alpha"], 0.0),
    }


def _pick_tile(m, k, cp):
    """Row tile in output pixels: ~4096, VMEM-budgeted, >= 2 grid steps when
    there is enough work (v7x megacore / pipeline overlap)."""
    # conservative per-pixel VMEM bytes: double-buffered bf16 A + bf16 y blocks
    # (both kernels) + live f32 accumulator.
    bytes_per_pix = 4 * k + 12 * cp
    budget = 20 * 1024 * 1024          # well under v7x's 64 MiB physical VMEM
    cap = max(SUBLANE, (budget // max(bytes_per_pix, 1)) // SUBLANE * SUBLANE)
    tm = min(4096, cap)
    if m > 2 * SUBLANE:
        tm = min(tm, _round_up(_cdiv(m, 2), SUBLANE))
    return max(SUBLANE, min(tm, _round_up(m, SUBLANE)))


@functools.partial(jax.jit,
                   static_argnames=("out_ch", "ksize", "stride", "padding",
                                    "state", "eps", "nhwc_out"))
def conv_bn_prelu(x_nchw, w2, gamma, beta, alpha, *, out_ch, ksize, stride,
                  padding, state=True, eps=1e-3, nhwc_out=False):
    """ConvBNPReLU.forward: Conv2d(bias=False) [+ BatchNorm2d(batch stats) + PReLU]."""
    n, cin, h, w = x_nchw.shape
    kh = kw = ksize
    k_dim, cp = w2.shape
    assert k_dim == kh * kw * cin, (k_dim, kh, kw, cin)
    s, p = stride, padding

    ho = (h + 2 * p - kh) // s + 1
    wo = (w + 2 * p - kw) // s + 1
    m = n * ho * wo

    # ---- XLA-side tap-major im2col staging (single pass; per-tile contiguous) ----
    x = jnp.transpose(x_nchw, (0, 2, 3, 1)).astype(jnp.bfloat16)       # NHWC
    xp = jnp.pad(x, ((0, 0), (p, p), (p, p), (0, 0)))
    taps = [xp[:, ki:ki + s * (ho - 1) + 1:s, kj:kj + s * (wo - 1) + 1:s, :]
            for ki in range(kh) for kj in range(kw)]
    a = jnp.concatenate(taps, axis=-1).reshape(m, k_dim)               # (m, K)

    tm = _pick_tile(m, k_dim, cp)
    m_pad = _round_up(m, tm)
    n_tiles = m_pad // tm
    a = jnp.pad(a, ((0, m_pad - m), (0, 0)))        # zero rows -> zero y rows

    cparams = pltpu.CompilerParams(dimension_semantics=("parallel",),
                                   vmem_limit_bytes=32 * 1024 * 1024)

    y, part = pl.pallas_call(
        _conv_stats_kernel,
        out_shape=(jax.ShapeDtypeStruct((m_pad, cp), jnp.bfloat16),
                   jax.ShapeDtypeStruct((n_tiles, 8, cp), jnp.float32)),
        grid=(n_tiles,),
        in_specs=[
            pl.BlockSpec((tm, k_dim), lambda i: (i, 0)),
            pl.BlockSpec((k_dim, cp), lambda i: (0, 0)),
        ],
        out_specs=(
            pl.BlockSpec((tm, cp), lambda i: (i, 0)),
            pl.BlockSpec((1, 8, cp), lambda i: (i, 0, 0)),
        ),
        compiler_params=cparams,
    )(a, w2)

    if state:
        # Finish BN batch statistics from the fused per-tile partial sums.
        # Padded rows/channels contribute exactly zero; divide by the true count.
        # TODO(synk): E[x^2]-mean^2 can cancel when |mean| >> std at very large
        #             pixel counts; a Welford-style combine would be more robust.
        tot = jnp.sum(part, axis=0)                              # (8, Cp)
        count = jnp.float32(m)
        mean = (tot[0] / count).reshape(1, cp)
        var = jnp.maximum((tot[1] / count).reshape(1, cp) - mean * mean, 0.0)
        inv = lax.rsqrt(var + jnp.float32(eps))
        scale = gamma * inv                                      # (1, Cp)
        shift = beta - mean * scale                              # (1, Cp)

        out2d = pl.pallas_call(
            _bn_prelu_kernel,
            out_shape=jax.ShapeDtypeStruct((m_pad, cp), jnp.bfloat16),
            grid=(n_tiles,),
            in_specs=[
                pl.BlockSpec((tm, cp), lambda i: (i, 0)),
                pl.BlockSpec((1, cp), lambda i: (0, 0)),
                pl.BlockSpec((1, cp), lambda i: (0, 0)),
                pl.BlockSpec((1, cp), lambda i: (0, 0)),
            ],
            out_specs=pl.BlockSpec((tm, cp), lambda i: (i, 0)),
            input_output_aliases={0: 0},          # write BN+PReLU in-place over y
            compiler_params=cparams,
        )(y, scale, shift, alpha)
    else:
        out2d = y

    out = out2d[:m, :out_ch].reshape(n, ho, wo, out_ch)          # bf16 epilogue
    if nhwc_out:
        return out                                               # bf16 NHWC
    return jnp.transpose(out, (0, 3, 1, 2)).astype(jnp.float32)  # NCHW f32


if __name__ == "__main__":
    # Typical usage in the network: ConvBNPReLU(in_ch, out_ch, 3, 2, 1, state=True)
    n, in_ch, h, w = 2, 4, 32, 32
    out_ch, ksize, stride, padding = 8, 3, 2, 1
    eps = 1e-3
    state = True

    key = jax.random.PRNGKey(0)
    kx, kc = jax.random.split(key)
    x = jax.random.normal(kx, (n, in_ch, h, w), jnp.float32)
    params = {
        "conv_w": 0.05 * jax.random.normal(kc, (out_ch, in_ch, ksize, ksize),
                                           jnp.float32),
        "bn_gamma": jnp.ones((out_ch,), jnp.float32),
        "bn_beta": jnp.zeros((out_ch,), jnp.float32),
        "prelu_alpha": jnp.full((out_ch,), 0.25, jnp.float32),   # PyTorch PReLU init
    }
    prep = prepare_params(params, out_ch)

    out = conv_bn_prelu(x, prep["w2"], prep["gamma"], prep["beta"], prep["alpha"],
                        out_ch=out_ch, ksize=ksize, stride=stride,
                        padding=padding, state=state, eps=eps)
    out = jax.block_until_ready(out)
    assert out.shape == (n, out_ch, h // stride, w // stride), out.shape

    # Reference using the same bf16-rounded conv operands (bf16 intermediates in
    # the kernel add a small, bounded extra rounding error).
    xb = x.astype(jnp.bfloat16).astype(jnp.float32)
    wb = params["conv_w"].astype(jnp.bfloat16).astype(jnp.float32)
    ref = lax.conv_general_dilated(
        xb, wb, window_strides=(stride, stride),
        padding=[(padding, padding), (padding, padding)],
        dimension_numbers=("NCHW", "OIHW", "NCHW"))
    if state:
        mean = ref.mean(axis=(0, 2, 3), keepdims=True)
        var = ref.var(axis=(0, 2, 3), keepdims=True)             # biased, train mode
        ref = (ref - mean) * lax.rsqrt(var + eps)
        ref = ref * params["bn_gamma"].reshape(1, -1, 1, 1) \
              + params["bn_beta"].reshape(1, -1, 1, 1)
        a_ = params["prelu_alpha"].reshape(1, -1, 1, 1)
        ref = jnp.where(ref >= 0, ref, ref * a_)
    err = float(jnp.max(jnp.abs(out - ref)))
    assert err < 6e-2, f"max |err| = {err}"
    print("KERNEL_OK")
</pallas_src>

<mosaic_0001>
module attributes {stable_mosaic.version = 11 : i64} {
  func.func @_conv_stats_kernel(%arg0: i32, %arg1: memref<256x36xbf16, #tpu.memory_space<vmem>>, %arg2: memref<36x128xbf16, #tpu.memory_space<vmem>>, %arg3: memref<256x128xbf16, #tpu.memory_space<vmem>>, %arg4: memref<1x8x128xf32, #tpu.memory_space<vmem>>) attributes {dimension_semantics = [#tpu.dimension_semantics<parallel>], iteration_bounds = array<i64: 2>, scalar_prefetch = 0 : i64, scratch_operands = 0 : i64, tpu.core_type = #tpu.core_type<tc>, window_params = [{transform_indices = @transform_0, window_bounds = array<i64: 256, 36>}, {pipeline_mode = #tpu.pipeline_mode<synchronous>, transform_indices = @transform_1, window_bounds = array<i64: 36, 128>}, {transform_indices = @transform_2, window_bounds = array<i64: 256, 128>}, {transform_indices = @transform_3, window_bounds = array<i64: 1, 8, 128>}]} {
    %c0 = arith.constant 0 : index
    %c0_0 = arith.constant 0 : index
    %0 = vector.load %arg1[%c0, %c0_0] : memref<256x36xbf16, #tpu.memory_space<vmem>>, vector<256x36xbf16>
    %c0_1 = arith.constant 0 : index
    %c0_2 = arith.constant 0 : index
    %1 = vector.load %arg2[%c0_1, %c0_2] : memref<36x128xbf16, #tpu.memory_space<vmem>>, vector<36x128xbf16>
    %cst = arith.constant dense<0.000000e+00> : vector<256x128xf32>
    %2 = tpu.matmul %0, %1, %cst {dimension_numbers = #tpu.dot_dimension_numbers<[1], [0], [0], [1], [0, 0, 1, 1], [], []>} : vector<256x36xbf16>, vector<36x128xbf16>, vector<256x128xf32> -> vector<256x128xf32>
    %3 = arith.truncf %2 : vector<256x128xf32> to vector<256x128xbf16>
    %c0_3 = arith.constant 0 : index
    %c0_4 = arith.constant 0 : index
    %4 = vector.load %arg3[%c0_3, %c0_4] : memref<256x128xbf16, #tpu.memory_space<vmem>>, vector<256x128xbf16>
    tpu.vector_store %arg3[%c0_3, %c0_4], %3 {strides = array<i32>} : memref<256x128xbf16, #tpu.memory_space<vmem>>, vector<256x128xbf16>,
    %cst_5 = arith.constant dense<0.000000e+00> : vector<128xf32>
    %5 = vector.multi_reduction <add>, %2, %cst_5 [0] : vector<256x128xf32> to vector<128xf32>
    %6 = vector.shape_cast %5 : vector<128xf32> to vector<1x128xf32>
    %7 = vector.shape_cast %6 : vector<1x128xf32> to vector<1x128xf32>
    %8 = vector.broadcast %7 : vector<1x128xf32> to vector<8x128xf32>
    %9 = arith.mulf %2, %2 : vector<256x128xf32>
    %cst_6 = arith.constant dense<0.000000e+00> : vector<128xf32>
    %10 = vector.multi_reduction <add>, %9, %cst_6 [0] : vector<256x128xf32> to vector<128xf32>
    %11 = vector.shape_cast %10 : vector<128xf32> to vector<1x128xf32>
    %12 = vector.shape_cast %11 : vector<1x128xf32> to vector<1x128xf32>
    %13 = vector.broadcast %12 : vector<1x128xf32> to vector<8x128xf32>
    %14 = tpu.iota {dimensions = array<i32: 0>} : vector<8x128xi32>
    %c0_i32 = arith.constant 0 : i32
    %15 = vector.broadcast %c0_i32 : i32 to vector<8x128xi32>
    %16 = arith.cmpi eq, %14, %15 : vector<8x128xi32>
    %c1_i32 = arith.constant 1 : i32
    %17 = vector.broadcast %c1_i32 : i32 to vector<8x128xi32>
    %18 = arith.cmpi eq, %14, %17 : vector<8x128xi32>
    %cst_7 = arith.constant 0.000000e+00 : f32
    %19 = vector.broadcast %cst_7 : f32 to vector<8x128xf32>
    %20 = arith.select %18, %13, %19 : vector<8x128xi1>, vector<8x128xf32>
    %21 = arith.select %16, %8, %20 : vector<8x128xi1>, vector<8x128xf32>
    %c0_8 = arith.constant 0 : index
    %c0_9 = arith.constant 0 : index
    %c0_10 = arith.constant 0 : index
    %22 = vector.load %arg4[%c0_8, %c0_9, %c0_10] : memref<1x8x128xf32, #tpu.memory_space<vmem>>, vector<1x8x128xf32>
    %23 = vector.shape_cast %22 : vector<1x8x128xf32> to vector<8x128xf32>
    %24 = vector.shape_cast %21 : vector<8x128xf32> to vector<1x8x128xf32>
    tpu.vector_store %arg4[%c0_8, %c0_9, %c0_10], %24 {strides = array<i32>} : memref<1x8x128xf32, #tpu.memory_space<vmem>>, vector<1x8x128xf32>,
    return
  }
  func.func @transform_0(%arg0: i32) -> (i32, i32) {
    %c0_i32 = arith.constant 0 : i32
    %c0_i32_0 = arith.constant 0 : i32
    return %arg0, %c0_i32 : i32, i32
  }
  func.func @transform_1(%arg0: i32) -> (i32, i32) {
    %c0_i32 = arith.constant 0 : i32
    %c0_i32_0 = arith.constant 0 : i32
    %c0_i32_1 = arith.constant 0 : i32
    return %c0_i32, %c0_i32_0 : i32, i32
  }
  func.func @transform_2(%arg0: i32) -> (i32, i32) {
    %c0_i32 = arith.constant 0 : i32
    %c0_i32_0 = arith.constant 0 : i32
    return %arg0, %c0_i32 : i32, i32
  }
  func.func @transform_3(%arg0: i32) -> (i32, i32, i32) {
    %c0_i32 = arith.constant 0 : i32
    %c0_i32_0 = arith.constant 0 : i32
    %c0_i32_1 = arith.constant 0 : i32
    return %arg0, %c0_i32, %c0_i32_0 : i32, i32, i32
  }
}

module attributes {stable_mosaic.version = 11 : i64} {
  func.func @_bn_prelu_kernel(%arg0: i32, %arg1: memref<256x128xbf16, #tpu.memory_space<vmem>>, %arg2: memref<1x128xf32, #tpu.memory_space<vmem>>, %arg3: memref<1x128xf32, #tpu.memory_space<vmem>>, %arg4: memref<1x128xf32, #tpu.memory_space<vmem>>, %arg5: memref<256x128xbf16, #tpu.memory_space<vmem>>) attributes {dimension_semantics = [#tpu.dimension_semantics<parallel>], iteration_bounds = array<i64: 2>, scalar_prefetch = 0 : i64, scratch_operands = 0 : i64, tpu.core_type = #tpu.core_type<tc>, window_params = [{transform_indices = @transform_0, window_bounds = array<i64: 256, 128>}, {pipeline_mode = #tpu.pipeline_mode<synchronous>, transform_indices = @transform_1, window_bounds = array<i64: 1, 128>}, {pipeline_mode = #tpu.pipeline_mode<synchronous>, transform_indices = @transform_2, window_bounds = array<i64: 1, 128>}, {pipeline_mode = #tpu.pipeline_mode<synchronous>, transform_indices = @transform_3, window_bounds = array<i64: 1, 128>}, {transform_indices = @transform_4, window_bounds = array<i64: 256, 128>}]} {
    %c0 = arith.constant 0 : index
    %c0_0 = arith.constant 0 : index
    %0 = vector.load %arg1[%c0, %c0_0] : memref<256x128xbf16, #tpu.memory_space<vmem>>, vector<256x128xbf16>
    %1 = arith.extf %0 : vector<256x128xbf16> to vector<256x128xf32>
    %c0_1 = arith.constant 0 : index
    %c0_2 = arith.constant 0 : index
    %2 = vector.load %arg2[%c0_1, %c0_2] : memref<1x128xf32, #tpu.memory_space<vmem>>, vector<1x128xf32>
    %3 = vector.broadcast %2 : vector<1x128xf32> to vector<256x128xf32>
    %4 = arith.mulf %1, %3 : vector<256x128xf32>
    %c0_3 = arith.constant 0 : index
    %c0_4 = arith.constant 0 : index
    %5 = vector.load %arg3[%c0_3, %c0_4] : memref<1x128xf32, #tpu.memory_space<vmem>>, vector<1x128xf32>
    %6 = vector.broadcast %5 : vector<1x128xf32> to vector<256x128xf32>
    %7 = arith.addf %4, %6 : vector<256x128xf32>
    %cst = arith.constant 0.000000e+00 : f32
    %8 = vector.broadcast %cst : f32 to vector<256x128xf32>
    %9 = arith.cmpf oge, %7, %8 : vector<256x128xf32>
    %c0_5 = arith.constant 0 : index
    %c0_6 = arith.constant 0 : index
    %10 = vector.load %arg4[%c0_5, %c0_6] : memref<1x128xf32, #tpu.memory_space<vmem>>, vector<1x128xf32>
    %11 = vector.broadcast %10 : vector<1x128xf32> to vector<256x128xf32>
    %12 = arith.mulf %7, %11 : vector<256x128xf32>
    %13 = arith.select %9, %7, %12 : vector<256x128xi1>, vector<256x128xf32>
    %14 = arith.truncf %13 : vector<256x128xf32> to vector<256x128xbf16>
    %c0_7 = arith.constant 0 : index
    %c0_8 = arith.constant 0 : index
    %15 = vector.load %arg5[%c0_7, %c0_8] : memref<256x128xbf16, #tpu.memory_space<vmem>>, vector<256x128xbf16>
    tpu.vector_store %arg5[%c0_7, %c0_8], %14 {strides = array<i32>} : memref<256x128xbf16, #tpu.memory_space<vmem>>, vector<256x128xbf16>,
    return
  }
  func.func @transform_0(%arg0: i32) -> (i32, i32) {
    %c0_i32 = arith.constant 0 : i32
    %c0_i32_0 = arith.constant 0 : i32
    return %arg0, %c0_i32 : i32, i32
  }
  func.func @transform_1(%arg0: i32) -> (i32, i32) {
    %c0_i32 = arith.constant 0 : i32
    %c0_i32_0 = arith.constant 0 : i32
    %c0_i32_1 = arith.constant 0 : i32
    return %c0_i32, %c0_i32_0 : i32, i32
  }
  func.func @transform_2(%arg0: i32) -> (i32, i32) {
    %c0_i32 = arith.constant 0 : i32
    %c0_i32_0 = arith.constant 0 : i32
    %c0_i32_1 = arith.constant 0 : i32
    return %c0_i32, %c0_i32_0 : i32, i32
  }
  func.func @transform_3(%arg0: i32) -> (i32, i32) {
    %c0_i32 = arith.constant 0 : i32
    %c0_i32_0 = arith.constant 0 : i32
    %c0_i32_1 = arith.constant 0 : i32
    return %c0_i32, %c0_i32_0 : i32, i32
  }
  func.func @transform_4(%arg0: i32) -> (i32, i32) {
    %c0_i32 = arith.constant 0 : i32
    %c0_i32_0 = arith.constant 0 : i32
    return %arg0, %c0_i32 : i32, i32
  }
}

</mosaic_0001>

<bundles_post_ra>
// kernel: conv_bn_prelu.2
= control target key start
LH: loop header
LB: loop body
LE: loop exit
PB: predicated region body
PF: predicated region fallthrough
CT: control target
= control target key end

     0   :  { %s982_s12 = smov 0   ;;  %s1189_s0 = inlined_call_operand.vmem [shape: bf16[512,36], index: 0, kind: input, shape index: {}]   ;;  %s1190_s1 = inlined_call_operand.vmem [shape: bf16[36,128], index: 1, kind: input, shape index: {}]   ;;  %s1191_s2 = inlined_call_operand.vmem [shape: bf16[512,128], index: 2, kind: output, shape index: {0}]   ;;  %s1192_s3 = inlined_call_operand.vmem [shape: f32[2,8,128], index: 3, kind: output, shape index: {1}]  }
   0x1 LB: > { %s988_s13 = sadd.s32 4294967295, %s960_s12   ;;  %p728_p0 = scmp.ge.s32.totalorder %s960_s12, 1  ;;  %s960_s12 = sphi %s982_s12, %s14_s12  }
   0x2   : > { %p141_p1 = scmp.lt.s32.totalorder %s960_s12, 3 }
   0x4   : > { %p142_p2 = pnand %p728_p0, %p141_p1 }
   0x5   : > { %s729_s16 = sshll.u32 (!%p142_p2), %s988_s13, 5  ;;  %p181_p4 = scmp.lt.s32.totalorder (!%p142_p2), %s988_s13, 1 }
   0x6   : > { %145 = sbr.rel (%p142_p2) target bundleno = 277 (0x115), region = 28  ;;  %p170_p3 = scmp.lt.s32.totalorder (!%p142_p2), %s729_s16, 63 }
   0xb   : > { %v222_v0 = vld [vmem:[%s1190_s1 + $0x10] sm:$0x3]  ;;  %vm367_vm0 = vcmask 1041408   ;;  %s1194_s16 = smov (!%p170_p3, %s729_s16), 63  ;;  %v841_v4 = vld [vmem:[%s1190_s1 + $0x8] sm:$0xff]  ;;  %v840_v5 = vld [vmem:[%s1190_s1] sm:$0xff] }
   0xc   : > { %v312_v1 = vunpack.c.l.b16 %v222_v0  ;;  %s730_s19 = sshll.u32 %s1194_s16, 2  ;;  %vm318_vm1 = vcmask 293888   ;;  %s1196_s13 = smov (!%p181_p4, %s988_s13), 1 }
   0xd   : > { %s1010_s24 = scalar_lea.vmem %s1189_s0, %s730_s19  ;;  %s1053_s27 = scalar_lea.vmem %s1191_s2, %s730_s19 }
   0xe   : > { %v315_v2 = vpack.c.b16 %v312_v1, %v312_v1  ;;  %v824_v6 = vld [vmem:[%s1010_s24] sm:$0xff]  ;;  %v825_v10 = vld [vmem:[%s1010_s24 + $0x8] sm:$0xff]  ;;  %v826_v14 = vld [vmem:[%s1010_s24 + $0x10] sm:$0xff]  ;;  %s733_s28 = sshll.u32 %s1196_s13, 3 }
   0xf   : > { %v828_v7 = vld [vmem:[%s1010_s24 + $0x20] sm:$0xff]  ;;  %v829_v11 = vld [vmem:[%s1010_s24 + $0x28] sm:$0xff]  ;;  %v830_v15 = vld [vmem:[%s1010_s24 + $0x30] sm:$0xff]  ;;  %s184_s4 = scalar_lea.vmem %s1192_s3, %s733_s28 }
  0x10   : > { %v369_v3 = vsel %vm367_vm0, %v315_v2, 0  ;;  %v832_v8 = vld [vmem:[%s1010_s24 + $0x40] sm:$0xff]  ;;  %v833_v12 = vld [vmem:[%s1010_s24 + $0x48] sm:$0xff]  ;;  %v834_v16 = vld [vmem:[%s1010_s24 + $0x50] sm:$0xff] }
  0x11   : > { %376 = vmatpush.bf16.msra.mxu0 %v369_v3  ;;  %937 = vmatpush.bf16.msra.mxu1 %v369_v3  ;;  %v836_v9 = vld [vmem:[%s1010_s24 + $0x60] sm:$0xff]  ;;  %v837_v13 = vld [vmem:[%s1010_s24 + $0x68] sm:$0xff]  ;;  %v838_v17 = vld [vmem:[%s1010_s24 + $0x70] sm:$0xff] }
  0x12   : > { %938 = vmatpush.bf16.msra.mxu2 %v369_v3  ;;  %939 = vmatpush.bf16.msra.mxu3 %v369_v3  ;;  %v827_v18 = vld [vmem:[%s1010_s24 + $0x18] sm:$0xff] }
  0x13   : > { %v831_v19 = vld [vmem:[%s1010_s24 + $0x38] sm:$0xff] }
  0x14   : > { %v835_v20 = vld [vmem:[%s1010_s24 + $0x58] sm:$0xff] }
  0x15   : > { %377 = vmatpush.bf16.msra.mxu0 %v841_v4  ;;  %940 = vmatpush.bf16.msra.mxu1 %v841_v4  ;;  %v839_v21 = vld [vmem:[%s1010_s24 + $0x78] sm:$0xff] }
  0x16   : > { %941 = vmatpush.bf16.msra.mxu2 %v841_v4  ;;  %942 = vmatpush.bf16.msra.mxu3 %v841_v4 }
  0x19   : > { %378 = vmatpush.bf16.msra.mxu0 %v840_v5  ;;  %943 = vmatpush.bf16.msra.mxu1 %v840_v5 }
  0x1a   : > { %944 = vmatpush.bf16.msra.mxu2 %v840_v5  ;;  %945 = vmatpush.bf16.msra.mxu3 %v840_v5 }
  0x1c   : > { %806 = vmatmul.msk.bf16.vlgmr.msra.gmra.mxu0 %vm318_vm1, %v824_v6  ;;  %810 = vmatmul.msk.bf16.vlgmr.msra.gmra.mxu1 %vm318_vm1, %v828_v7 }
  0x1d   : > { %814 = vmatmul.msk.bf16.vlgmr.msra.gmra.mxu2 %vm318_vm1, %v832_v8  ;;  %818 = vmatmul.msk.bf16.vlgmr.msra.gmra.mxu3 %vm318_vm1, %v836_v9 }
  0x2c   : > { %807 = vmatmul.msk.bf16.gmra.mxu0 %vm318_vm1, %v825_v10  ;;  %811 = vmatmul.msk.bf16.gmra.mxu1 %vm318_vm1, %v829_v11 }
  0x2d   : > { %815 = vmatmul.msk.bf16.gmra.mxu2 %vm318_vm1, %v833_v12  ;;  %819 = vmatmul.msk.bf16.gmra.mxu3 %vm318_vm1, %v837_v13 }
  0x3c   : > { %808 = vmatmul.msk.bf16.gmra.mxu0 %vm318_vm1, %v826_v14  ;;  %812 = vmatmul.msk.bf16.gmra.mxu1 %vm318_vm1, %v830_v15 }
  0x3d   : > { %816 = vmatmul.msk.bf16.gmra.mxu2 %vm318_vm1, %v834_v16  ;;  %820 = vmatmul.msk.bf16.gmra.mxu3 %vm318_vm1, %v838_v17 }
  0x4c   : > { %809 = vmatmul.msk.bf16.gmra.mxu0 %vm318_vm1, %v827_v18  ;;  %813 = vmatmul.msk.bf16.gmra.mxu1 %vm318_vm1, %v831_v19 }
  0x4d   : > { %817 = vmatmul.msk.bf16.gmra.mxu2 %vm318_vm1, %v835_v20  ;;  %821 = vmatmul.msk.bf16.gmra.mxu3 %vm318_vm1, %v839_v21 }
  0x99   : > { %v380_v22 = vpop.f32.mrf.mxu0  ;;  %v1044_v23 = vpop.f32.mrf.mxu1 }
  0x9a   : > { %v561_v55 = vmul.f32 %v380_v22, %v380_v22 }
  0xa0   : > { %v1046_v24 = vpop.f32.mrf.mxu2  ;;  %v1059_v29 = vpop.f32.mrf.mxu3 }
  0xa1   : > { %v382_v25 = vpop.f32.mrf.mxu0  ;;  %v1055_v26 = vpop.f32.mrf.mxu1 }
  0xa2   : > { %v845_v27 = vpack.c.bf16 %v382_v25, %v380_v22  ;;  %v865_v28 = vpack.c.bf16 %v1055_v26, %v1044_v23  ;;  %v562_v54 = vmul.f32 %v382_v25, %v382_v25  ;;  %v524_v57 = vadd.f32 %v382_v25, %v380_v22 }
  0xa3   : > { %v569_v25 = vmul.f32 %v1044_v23, %v1044_v23 }
  0xa4   : > { %846 = vst [vmem:[%s1053_s27] sm:$0xff] %v845_v27   ;;  %v593_v58 = vadd.f32 %v562_v54, %v561_v55 }
  0xa5   : > { %925 = vst [vmem:[%s1053_s27 + $0x20] sm:$0xff] %v865_v28  }
  0xa8   : > { %v1063_v30 = vpop.f32.mrf.mxu2  ;;  %v1069_v34 = vpop.f32.mrf.mxu3 }
  0xa9   : > { %v385_v31 = vpop.f32.mrf.mxu0  ;;  %v1065_v32 = vpop.f32.mrf.mxu1  ;;  %v885_v33 = vpack.c.bf16 %v1063_v30, %v1046_v24  ;;  %v905_v35 = vpack.c.bf16 %v1069_v34, %v1059_v29 }
  0xaa   : > { %v563_v56 = vmul.f32 %v385_v31, %v385_v31  ;;  %v525_v60 = vadd.f32 %v524_v57, %v385_v31 }
  0xab   : > { %929 = vst [vmem:[%s1053_s27 + $0x40] sm:$0xff] %v885_v33  }
  0xac   : > { %933 = vst [vmem:[%s1053_s27 + $0x60] sm:$0xff] %v905_v35   ;;  %v594_v62 = vadd.f32 %v593_v58, %v563_v56 }
  0xb0   : > { %v1075_v36 = vpop.f32.mrf.mxu2  ;;  %v1081_v41 = vpop.f32.mrf.mxu3 }
  0xb1   : > { %v387_v37 = vpop.f32.mrf.mxu0  ;;  %v1077_v38 = vpop.f32.mrf.mxu1 }
  0xb2   : > { %v850_v39 = vpack.c.bf16 %v387_v37, %v385_v31  ;;  %v870_v40 = vpack.c.bf16 %v1077_v38, %v1065_v32  ;;  %v564_v59 = vmul.f32 %v387_v37, %v387_v37  ;;  %v526_v3 = vadd.f32 %v525_v60, %v387_v37 }
  0xb3   : > { %v570_v31 = vmul.f32 %v1055_v26, %v1055_v26  ;;  %v571_v37 = vmul.f32 %v1065_v32, %v1065_v32 }
  0xb4   : > { %922 = vst [vmem:[%s1053_s27 + $0x8] sm:$0xff] %v850_v39   ;;  %v595_v5 = vadd.f32 %v594_v62, %v564_v59 }
  0xb5   : > { %926 = vst [vmem:[%s1053_s27 + $0x28] sm:$0xff] %v870_v40  }
  0xb8   : > { %v1085_v42 = vpop.f32.mrf.mxu2  ;;  %v1091_v46 = vpop.f32.mrf.mxu3 }
  0xb9   : > { %v390_v43 = vpop.f32.mrf.mxu0  ;;  %v1087_v44 = vpop.f32.mrf.mxu1  ;;  %v890_v45 = vpack.c.bf16 %v1085_v42, %v1075_v36  ;;  %v910_v47 = vpack.c.bf16 %v1091_v46, %v1081_v41 }
  0xba   : > { %v565_v63 = vmul.f32 %v390_v43, %v390_v43  ;;  %v527_v8 = vadd.f32 %v526_v3, %v390_v43  ;;  %v578_v3 = vmul.f32 %v1063_v30, %v1063_v30 }
  0xbb   : > { %930 = vst [vmem:[%s1053_s27 + $0x48] sm:$0xff] %v890_v45  }
  0xbc   : > { %934 = vst [vmem:[%s1053_s27 + $0x68] sm:$0xff] %v910_v47   ;;  %v596_v9 = vadd.f32 %v595_v5, %v565_v63 }
  0xc0   : > { %v1097_v48 = vpop.f32.mrf.mxu2  ;;  %v1103_v53 = vpop.f32.mrf.mxu3 }
  0xc1   : > { %v392_v49 = vpop.f32.mrf.mxu0  ;;  %v1099_v50 = vpop.f32.mrf.mxu1 }
  0xc2   : > { %v855_v51 = vpack.c.bf16 %v392_v49, %v390_v43  ;;  %v875_v52 = vpack.c.bf16 %v1099_v50, %v1087_v44  ;;  %v566_v6 = vmul.f32 %v392_v49, %v392_v49  ;;  %v528_v11 = vadd.f32 %v527_v8, %v392_v49 }
  0xc3   : > { %v580_v8 = vmul.f32 %v1085_v42, %v1085_v42 }
  0xc4   : > { %923 = vst [vmem:[%s1053_s27 + $0x10] sm:$0xff] %v855_v51   ;;  %v597_v12 = vadd.f32 %v596_v9, %v566_v6 }
  0xc5   : > { %927 = vst [vmem:[%s1053_s27 + $0x30] sm:$0xff] %v875_v52   ;;  %v573_v52 = vmul.f32 %v1087_v44, %v1087_v44 }
  0xc8   : > { %v1107_v61 = vpop.f32.mrf.mxu2  ;;  %v1111_v4 = vpop.f32.mrf.mxu3 }
  0xc9   : > { %v395_v0 = vpop.f32.mrf.mxu0  ;;  %v415_v1 = vpop.f32.mrf.mxu1  ;;  %v895_v2 = vpack.c.bf16 %v1107_v61, %v1097_v48  ;;  %v915_v7 = vpack.c.bf16 %v1111_v4, %v1103_v53 }
  0xca   : > { %v567_v10 = vmul.f32 %v395_v0, %v395_v0  ;;  %v529_v13 = vadd.f32 %v528_v11, %v395_v0  ;;  %v575_v59 = vmul.f32 %v415_v1, %v415_v1 }
  0xcb   : > { %931 = vst [vmem:[%s1053_s27 + $0x50] sm:$0xff] %v895_v2  }
  0xcc   : > { %935 = vst [vmem:[%s1053_s27 + $0x70] sm:$0xff] %v915_v7   ;;  %v598_v15 = vadd.f32 %v597_v12, %v567_v10 }
  0xd0   : > { %v435_v14 = vpop.f32.mrf.mxu2  ;;  %v1117_v22 = vpop.f32.mrf.mxu3 }
  0xd1   : > { %v397_v16 = vpop.f32.mrf.mxu0  ;;  %v417_v17 = vpop.f32.mrf.mxu1 }
  0xd2   : > { %v860_v18 = vpack.c.bf16 %v397_v16, %v395_v0  ;;  %v530_v19 = vadd.f32 %v529_v13, %v397_v16  ;;  %v568_v20 = vmul.f32 %v397_v16, %v397_v16  ;;  %v880_v21 = vpack.c.bf16 %v417_v17, %v415_v1 }
  0xd3   : > { %v576_v63 = vmul.f32 %v417_v17, %v417_v17  ;;  %v577_v0 = vmul.f32 %v1046_v24, %v1046_v24  ;;  %v582_v13 = vmul.f32 %v1107_v61, %v1107_v61 }
  0xd4   : > { %924 = vst [vmem:[%s1053_s27 + $0x18] sm:$0xff] %v860_v18   ;;  %v531_v27 = vadd.f32 %v530_v19, %v1044_v23  ;;  %v599_v28 = vadd.f32 %v598_v15, %v568_v20  ;;  %v572_v23 = vmul.f32 %v1077_v38, %v1077_v38 }
  0xd5   : > { %928 = vst [vmem:[%s1053_s27 + $0x38] sm:$0xff] %v880_v21  }
  0xd6   : > { %v532_v33 = vadd.f32 %v531_v27, %v1055_v26  ;;  %v600_v35 = vadd.f32 %v599_v28, %v569_v25 }
  0xd8   : > { %v533_v39 = vadd.f32 %v532_v33, %v1065_v32  ;;  %v601_v40 = vadd.f32 %v600_v35, %v570_v31  ;;  %v437_v43 = vpop.f32.mrf.mxu2  ;;  %v457_v51 = vpop.f32.mrf.mxu3  ;;  %v574_v32 = vmul.f32 %v1099_v50, %v1099_v50  ;;  %v588_v33 = vmul.f32 %v1091_v46, %v1091_v46 }
  0xd9   : > { %v900_v45 = vpack.c.bf16 %v437_v43, %v435_v14  ;;  %v920_v26 = vpack.c.bf16 %v457_v51, %v1117_v22  ;;  %v584_v20 = vmul.f32 %v437_v43, %v437_v43 }
  0xda   : > { %v602_v47 = vadd.f32 %v601_v40, %v571_v37  ;;  %v534_v49 = vadd.f32 %v533_v39, %v1077_v38  ;;  %v589_v37 = vmul.f32 %v1103_v53, %v1103_v53 }
  0xdb   : > { %932 = vst [vmem:[%s1053_s27 + $0x58] sm:$0xff] %v900_v45  }
  0xdc   : > { %v535_v54 = vadd.f32 %v534_v49, %v1087_v44  ;;  %v603_v55 = vadd.f32 %v602_v47, %v572_v23  ;;  %936 = vst [vmem:[%s1053_s27 + $0x78] sm:$0xff] %v920_v26   ;;  %v591_v47 = vmul.f32 %v1117_v22, %v1117_v22  ;;  %v592_v26 = vmul.f32 %v457_v51, %v457_v51 }
  0xde   : > { %v536_v56 = vadd.f32 %v535_v54, %v1099_v50  ;;  %v604_v57 = vadd.f32 %v603_v55, %v573_v52  ;;  %v579_v50 = vmul.f32 %v1075_v36, %v1075_v36 }
  0xe0   : > { %v537_v58 = vadd.f32 %v536_v56, %v415_v1  ;;  %v605_v38 = vadd.f32 %v604_v57, %v574_v32  ;;  %v630_v32 = vlaneseq }
  0xe2   : > { %v606_v60 = vadd.f32 %v605_v38, %v575_v59  ;;  %v538_v62 = vadd.f32 %v537_v58, %v417_v17  ;;  %v583_v17 = vmul.f32 %v435_v14, %v435_v14  ;;  %v631_v59 = vshrl.u32 %v630_v32, 7 }
  0xe4   : > { %v539_v2 = vadd.f32 %v538_v62, %v1046_v24  ;;  %v607_v44 = vadd.f32 %v606_v60, %v576_v63  ;;  %v581_v24 = vmul.f32 %v1097_v48, %v1097_v48  ;;  %vm633_vm2 = vcmp.eq.s32.totalorder %v631_v59, 1 }
  0xe5   : > { %vm632_vm3 = vcmp.eq.s32.totalorder %v631_v59, 0 }
  0xe6   : > { %v540_v5 = vadd.f32 %v539_v2, %v1063_v30  ;;  %v608_v6 = vadd.f32 %v607_v44, %v577_v0 }
  0xe8   : > { %v541_v1 = vadd.f32 %v540_v5, %v1075_v36  ;;  %v609_v7 = vadd.f32 %v608_v6, %v578_v3 }
  0xea   : > { %v610_v9 = vadd.f32 %v609_v7, %v579_v50  ;;  %v542_v10 = vadd.f32 %v541_v1, %v1085_v42  ;;  %v585_v42 = vmul.f32 %v1059_v29, %v1059_v29 }
  0xec   : > { %v543_v11 = vadd.f32 %v542_v10, %v1097_v48  ;;  %v611_v12 = vadd.f32 %v610_v9, %v580_v8  ;;  %v586_v48 = vmul.f32 %v1069_v34, %v1069_v34 }
  0xee   : > { %v544_v30 = vadd.f32 %v543_v11, %v1107_v61  ;;  %v612_v15 = vadd.f32 %v611_v12, %v581_v24  ;;  %v587_v61 = vmul.f32 %v1081_v41, %v1081_v41 }
  0xf0   : > { %v613_v36 = vadd.f32 %v612_v15, %v582_v13  ;;  %v545_v16 = vadd.f32 %v544_v30, %v435_v14 }
  0xf2   : > { %v614_v18 = vadd.f32 %v613_v36, %v583_v17  ;;  %v546_v19 = vadd.f32 %v545_v16, %v437_v43  ;;  %v590_v43 = vmul.f32 %v1111_v4, %v1111_v4 }
  0xf4   : > { %v547_v21 = vadd.f32 %v546_v19, %v1059_v29  ;;  %v615_v25 = vadd.f32 %v614_v18, %v584_v20 }
  0xf6   : > { %v548_v27 = vadd.f32 %v547_v21, %v1069_v34  ;;  %v616_v28 = vadd.f32 %v615_v25, %v585_v42 }
  0xf8   : > { %v549_v14 = vadd.f32 %v548_v27, %v1081_v41  ;;  %v617_v31 = vadd.f32 %v616_v28, %v586_v48 }
  0xfa   : > { %v618_v35 = vadd.f32 %v617_v31, %v587_v61  ;;  %v550_v29 = vadd.f32 %v549_v14, %v1091_v46 }
  0xfc   : > { %v551_v39 = vadd.f32 %v550_v29, %v1103_v53  ;;  %v619_v34 = vadd.f32 %v618_v35, %v588_v33 }
  0xfe   : > { %v552_v40 = vadd.f32 %v551_v39, %v1111_v4  ;;  %v620_v41 = vadd.f32 %v619_v34, %v589_v37 }
 0x100   : > { %v621_v45 = vadd.f32 %v620_v41, %v590_v43  ;;  %v553_v23 = vadd.f32 %v552_v40, %v1117_v22 }
 0x102   : > { %v622_v46 = vadd.f32 %v621_v45, %v591_v47  ;;  %v554_v49 = vadd.f32 %v553_v23, %v457_v51 }
 0x104   : > { %v555_v52 = vrot.slane %v554_v49, 4  ;;  %v623_v54 = vadd.f32 %v622_v46, %v592_v26 }
 0x106   : > { %v556_v53 = vadd.f32 %v555_v52, %v554_v49  ;;  %v624_v55 = vrot.slane %v623_v54, 4 }
 0x108   : > { %v557_v56 = vrot.slane %v556_v53, 2  ;;  %v625_v57 = vadd.f32 %v624_v55, %v623_v54 }
 0x10a   : > { %v558_v4 = vadd.f32 %v557_v56, %v556_v53  ;;  %v626_v58 = vrot.slane %v625_v57, 2 }
 0x10c   : > { %v627_v38 = vadd.f32 %v626_v58, %v625_v57  ;;  %v559_v60 = vrot.slane %v558_v4, 1 }
 0x10e   : > { %v628_v62 = vrot.slane %v627_v38, 1  ;;  %v560_v51 = vadd.f32 %v559_v60, %v558_v4 }
 0x110   : > { %v629_v22 = vadd.f32 %v628_v62, %v627_v38 }
 0x112   : > { %v634_v63 = vsel %vm633_vm2, %v629_v22, 0.0 }
 0x113   : > { %v635_v0 = vsel %vm632_vm3, %v560_v51, %v634_v63 }
 0x114   : > { %636 = vst [vmem:[%s184_s4] sm:$0xff] %v635_v0 }
 0x115 PF: > { %s14_s12 = sadd.s32 1, %s960_s12  }
 0x116   : > { %p11_p5 = scmp.ge.s32.totalorder %s14_s12, 4  }
 0x118   :  { %13 = sbr.rel (!%p11_p5) target bundleno = 1 (0x1), region = 70 }

// kernel: conv_bn_prelu.3
= control target key start
LH: loop header
LB: loop body
LE: loop exit
PB: predicated region body
PF: predicated region fallthrough
CT: control target
= control target key end

     0   :  { %s786_s15 = smov 0   ;;  %s1005_s0 = inlined_call_operand.vmem [shape: bf16[512,128], index: 0, kind: input, shape index: {}, may-alias: {0,4}]   ;;  %s1006_s1 = inlined_call_operand.vmem [shape: f32[1,128], index: 1, kind: input, shape index: {}]   ;;  %s1007_s2 = inlined_call_operand.vmem [shape: f32[1,128], index: 2, kind: input, shape index: {}]   ;;  %s1008_s3 = inlined_call_operand.vmem [shape: f32[1,128], index: 3, kind: input, shape index: {}]   ;;  %s1009_s4 = inlined_call_operand.vmem [shape: bf16[512,128], index: 4, kind: output, shape index: {}, may-alias: {0,4}]  }
   0x1 LB: > { %s557_s16 = sadd.s32 4294967295, %s759_s15   ;;  %p561_p0 = scmp.ge.s32.totalorder %s759_s15, 1  ;;  %s759_s15 = sphi %s786_s15, %s14_s15  }
   0x2   : > { %p163_p1 = scmp.lt.s32.totalorder %s759_s15, 3 }
   0x4   : > { %p164_p2 = pnand %p561_p0, %p163_p1 }
   0x5   : > { %s562_s17 = sshll.u32 (!%p164_p2), %s557_s16, 5 }
   0x6   : > { %167 = sbr.rel (%p164_p2) target bundleno = 71 (0x47), region = 36  ;;  %p190_p3 = scmp.lt.s32.totalorder (!%p164_p2), %s562_s17, 63 }
   0xb   : > { %s1011_s17 = smov (!%p190_p3, %s562_s17), 63  ;;  %v750_v36 = vld [vmem:[%s1006_s1] ss:$0 sm:$0xff] }
   0xc   : > { %s563_s18 = sshll.u32 %s1011_s17, 2 }
   0xd   : > { %s802_s21 = scalar_lea.vmem %s1005_s0, %s563_s18  ;;  %s884_s30 = scalar_lea.vmem %s1009_s4, %s563_s18 }
   0xe   : > { %v569_v0 = vld [vmem:[%s802_s21] sm:$0xff]   ;;  %v712_v1 = vld [vmem:[%s802_s21 + $0x8] sm:$0xff]   ;;  %v713_v2 = vld [vmem:[%s802_s21 + $0x10] sm:$0xff]  }
   0xf   : > { %v570_v3 = vunpack.c.l.bf16 %v569_v0  ;;  %v571_v4 = vunpack.c.h.bf16 %v569_v0  ;;  %v574_v5 = vunpack.c.l.bf16 %v712_v1  ;;  %v575_v6 = vunpack.c.h.bf16 %v712_v1  ;;  %v714_v7 = vld [vmem:[%s802_s21 + $0x18] sm:$0xff]   ;;  %v715_v8 = vld [vmem:[%s802_s21 + $0x20] sm:$0xff]   ;;  %v716_v9 = vld [vmem:[%s802_s21 + $0x28] sm:$0xff]  }
  0x10   : > { %v578_v10 = vunpack.c.l.bf16 %v713_v2  ;;  %v579_v11 = vunpack.c.h.bf16 %v713_v2  ;;  %v582_v12 = vunpack.c.l.bf16 %v714_v7  ;;  %v583_v13 = vunpack.c.h.bf16 %v714_v7  ;;  %v717_v14 = vld [vmem:[%s802_s21 + $0x30] sm:$0xff]   ;;  %v718_v15 = vld [vmem:[%s802_s21 + $0x38] sm:$0xff]   ;;  %v719_v16 = vld [vmem:[%s802_s21 + $0x40] sm:$0xff]  }
  0x11   : > { %v586_v17 = vunpack.c.l.bf16 %v715_v8  ;;  %v587_v18 = vunpack.c.h.bf16 %v715_v8  ;;  %v590_v19 = vunpack.c.l.bf16 %v716_v9  ;;  %v591_v20 = vunpack.c.h.bf16 %v716_v9  ;;  %v720_v21 = vld [vmem:[%s802_s21 + $0x48] sm:$0xff]   ;;  %v721_v22 = vld [vmem:[%s802_s21 + $0x50] sm:$0xff]   ;;  %v722_v23 = vld [vmem:[%s802_s21 + $0x58] sm:$0xff]  }
  0x12   : > { %v594_v24 = vunpack.c.l.bf16 %v717_v14  ;;  %v595_v25 = vunpack.c.h.bf16 %v717_v14  ;;  %v598_v26 = vunpack.c.l.bf16 %v718_v15  ;;  %v599_v27 = vunpack.c.h.bf16 %v718_v15  ;;  %v723_v28 = vld [vmem:[%s802_s21 + $0x60] sm:$0xff]   ;;  %v724_v29 = vld [vmem:[%s802_s21 + $0x68] sm:$0xff]   ;;  %v725_v34 = vld [vmem:[%s802_s21 + $0x70] sm:$0xff]  }
  0x13   : > { %v602_v30 = vunpack.c.l.bf16 %v719_v16  ;;  %v603_v31 = vunpack.c.h.bf16 %v719_v16  ;;  %v606_v32 = vunpack.c.l.bf16 %v720_v21  ;;  %v607_v33 = vunpack.c.h.bf16 %v720_v21  ;;  %v726_v35 = vld [vmem:[%s802_s21 + $0x78] sm:$0xff]  }
  0x14   : > { %v610_v37 = vunpack.c.l.bf16 %v721_v22  ;;  %v611_v38 = vunpack.c.h.bf16 %v721_v22  ;;  %v614_v39 = vunpack.c.l.bf16 %v722_v23  ;;  %v615_v40 = vunpack.c.h.bf16 %v722_v23 }
  0x15   : > { %v618_v41 = vunpack.c.l.bf16 %v723_v28  ;;  %v619_v42 = vunpack.c.h.bf16 %v723_v28  ;;  %v622_v43 = vunpack.c.l.bf16 %v724_v29  ;;  %v623_v44 = vunpack.c.h.bf16 %v724_v29 }
  0x16   : > { %v626_v45 = vunpack.c.l.bf16 %v725_v34  ;;  %v627_v46 = vunpack.c.h.bf16 %v725_v34  ;;  %v630_v47 = vunpack.c.l.bf16 %v726_v35  ;;  %v631_v48 = vunpack.c.h.bf16 %v726_v35 }
  0x17   : > { %v269_v49 = vmul.f32 %v750_v36, %v570_v3  ;;  %v270_v50 = vmul.f32 %v750_v36, %v571_v4  ;;  %v271_v51 = vmul.f32 %v750_v36, %v574_v5  ;;  %v272_v52 = vmul.f32 %v750_v36, %v575_v6  ;;  %v751_v3 = vld [vmem:[%s1007_s2] ss:$0 sm:$0xff] }
  0x18   : > { %v273_v53 = vmul.f32 %v750_v36, %v578_v10  ;;  %v274_v54 = vmul.f32 %v750_v36, %v579_v11  ;;  %v275_v55 = vmul.f32 %v750_v36, %v582_v12  ;;  %v276_v56 = vmul.f32 %v750_v36, %v583_v13 }
  0x19   : > { %v277_v57 = vmul.f32 %v750_v36, %v586_v17  ;;  %v278_v58 = vmul.f32 %v750_v36, %v587_v18  ;;  %v279_v59 = vmul.f32 %v750_v36, %v590_v19  ;;  %v280_v60 = vmul.f32 %v750_v36, %v591_v20 }
  0x1a   : > { %v281_v61 = vmul.f32 %v750_v36, %v594_v24  ;;  %v282_v62 = vmul.f32 %v750_v36, %v595_v25  ;;  %v283_v63 = vmul.f32 %v750_v36, %v598_v26  ;;  %v284_v0 = vmul.f32 %v750_v36, %v599_v27 }
  0x1b   : > { %v285_v1 = vmul.f32 %v750_v36, %v602_v30  ;;  %v286_v2 = vmul.f32 %v750_v36, %v603_v31  ;;  %v287_v7 = vmul.f32 %v750_v36, %v606_v32  ;;  %v288_v8 = vmul.f32 %v750_v36, %v607_v33 }
  0x1c   : > { %v289_v4 = vmul.f32 %v750_v36, %v610_v37  ;;  %v290_v5 = vmul.f32 %v750_v36, %v611_v38  ;;  %v291_v6 = vmul.f32 %v750_v36, %v614_v39  ;;  %v292_v9 = vmul.f32 %v750_v36, %v615_v40  ;;  %v849_v38 = vld [vmem:[%s1008_s3] ss:$0 sm:$0xff] }
  0x1d   : > { %v293_v10 = vmul.f32 %v750_v36, %v618_v41  ;;  %v294_v11 = vmul.f32 %v750_v36, %v619_v42  ;;  %v295_v12 = vmul.f32 %v750_v36, %v622_v43  ;;  %v296_v13 = vmul.f32 %v750_v36, %v623_v44 }
  0x1e   : > { %v297_v14 = vmul.f32 %v750_v36, %v626_v45  ;;  %v298_v15 = vmul.f32 %v750_v36, %v627_v46  ;;  %v299_v16 = vmul.f32 %v750_v36, %v630_v47  ;;  %v300_v17 = vmul.f32 %v750_v36, %v631_v48 }
  0x1f   : > { %v305_v18 = vadd.f32 %v751_v3, %v269_v49  ;;  %v306_v19 = vadd.f32 %v751_v3, %v270_v50  ;;  %v307_v20 = vadd.f32 %v751_v3, %v271_v51  ;;  %v308_v21 = vadd.f32 %v751_v3, %v272_v52 }
  0x20   : > { %v309_v22 = vadd.f32 %v751_v3, %v273_v53  ;;  %v310_v23 = vadd.f32 %v751_v3, %v274_v54  ;;  %v311_v24 = vadd.f32 %v751_v3, %v275_v55  ;;  %v312_v25 = vadd.f32 %v751_v3, %v276_v56 }
  0x21   : > { %v313_v26 = vadd.f32 %v751_v3, %v277_v57  ;;  %v314_v27 = vadd.f32 %v751_v3, %v278_v58  ;;  %v826_v28 = vadd.f32 %v751_v3, %v279_v59  ;;  %v828_v29 = vadd.f32 %v751_v3, %v280_v60 }
  0x22   : > { %v830_v30 = vadd.f32 %v751_v3, %v281_v61  ;;  %v832_v31 = vadd.f32 %v751_v3, %v282_v62  ;;  %v834_v32 = vadd.f32 %v751_v3, %v283_v63  ;;  %v836_v33 = vadd.f32 %v751_v3, %v284_v0 }
  0x23   : > { %v838_v34 = vadd.f32 %v751_v3, %v285_v1  ;;  %v840_v35 = vadd.f32 %v751_v3, %v286_v2  ;;  %v842_v36 = vadd.f32 %v751_v3, %v287_v7  ;;  %v844_v37 = vadd.f32 %v751_v3, %v288_v8 }
  0x24   : > { %v851_v39 = vadd.f32 %v751_v3, %v289_v4  ;;  %v853_v40 = vadd.f32 %v751_v3, %v290_v5  ;;  %v855_v41 = vadd.f32 %v751_v3, %v291_v6  ;;  %v857_v42 = vadd.f32 %v751_v3, %v292_v9 }
  0x25   : > { %v859_v43 = vadd.f32 %v751_v3, %v293_v10  ;;  %v861_v44 = vadd.f32 %v751_v3, %v294_v11  ;;  %v863_v45 = vadd.f32 %v751_v3, %v295_v12  ;;  %v865_v46 = vadd.f32 %v751_v3, %v296_v13 }
  0x26   : > { %v867_v47 = vadd.f32 %v751_v3, %v297_v14  ;;  %v869_v48 = vadd.f32 %v751_v3, %v298_v15  ;;  %v871_v49 = vadd.f32 %v751_v3, %v299_v16  ;;  %v873_v50 = vadd.f32 %v751_v3, %v300_v17 }
  0x27   : > { %vm337_vm0 = vcmp.ge.f32.partialorder %v305_v18, 0.0  ;;  %vm338_vm1 = vcmp.ge.f32.partialorder %v306_v19, 0.0  ;;  %v373_v51 = vmul.f32 %v849_v38, %v305_v18  ;;  %v374_v52 = vmul.f32 %v849_v38, %v306_v19 }
  0x28   : > { %vm339_vm2 = vcmp.ge.f32.partialorder %v307_v20, 0.0  ;;  %vm340_vm3 = vcmp.ge.f32.partialorder %v308_v21, 0.0  ;;  %v375_v53 = vmul.f32 %v849_v38, %v307_v20  ;;  %v376_v54 = vmul.f32 %v849_v38, %v308_v21 }
  0x29   : > { %v405_v55 = vsel %vm337_vm0, %v305_v18, %v373_v51  ;;  %v406_v56 = vsel %vm338_vm1, %v306_v19, %v374_v52  ;;  %vm341_vm4 = vcmp.ge.f32.partialorder %v309_v22, 0.0  ;;  %vm342_vm5 = vcmp.ge.f32.partialorder %v310_v23, 0.0 }
  0x2a   : > { %v635_v57 = vpack.c.bf16 %v406_v56, %v405_v55  ;;  %v407_v58 = vsel %vm339_vm2, %v307_v20, %v375_v53  ;;  %v408_v59 = vsel %vm340_vm3, %v308_v21, %v376_v54  ;;  %v377_v60 = vmul.f32 %v849_v38, %v309_v22 }
  0x2b   : > { %v640_v61 = vpack.c.bf16 %v408_v59, %v407_v58  ;;  %v378_v62 = vmul.f32 %v849_v38, %v310_v23  ;;  %vm343_vm6 = vcmp.ge.f32.partialorder %v311_v24, 0.0  ;;  %vm344_vm7 = vcmp.ge.f32.partialorder %v312_v25, 0.0 }
  0x2c   : > { %636 = vst [vmem:[%s884_s30] sm:$0xff] %v635_v57   ;;  %v409_v63 = vsel %vm341_vm4, %v309_v22, %v377_v60  ;;  %v379_v0 = vmul.f32 %v849_v38, %v311_v24  ;;  %v380_v1 = vmul.f32 %v849_v38, %v312_v25  ;;  %vm345_vm8 = vcmp.ge.f32.partialorder %v313_v26, 0.0 }
  0x2d   : > { %727 = vst [vmem:[%s884_s30 + $0x8] sm:$0xff] %v640_v61   ;;  %v410_v2 = vsel %vm342_vm5, %v310_v23, %v378_v62  ;;  %vm346_vm9 = vcmp.ge.f32.partialorder %v314_v27, 0.0  ;;  %v381_v7 = vmul.f32 %v849_v38, %v313_v26  ;;  %v382_v8 = vmul.f32 %v849_v38, %v314_v27 }
  0x2e   : > { %v645_v3 = vpack.c.bf16 %v410_v2, %v409_v63  ;;  %v411_v4 = vsel %vm343_vm6, %v311_v24, %v379_v0  ;;  %v412_v5 = vsel %vm344_vm7, %v312_v25, %v380_v1  ;;  %vm347_vm10 = vcmp.ge.f32.partialorder %v826_v28, 0.0 }
  0x2f   : > { %v650_v6 = vpack.c.bf16 %v412_v5, %v411_v4  ;;  %v413_v9 = vsel %vm345_vm8, %v313_v26, %v381_v7  ;;  %v414_v10 = vsel %vm346_vm9, %v314_v27, %v382_v8  ;;  %vm348_vm11 = vcmp.ge.f32.partialorder %v828_v29, 0.0 }
  0x30   : > { %728 = vst [vmem:[%s884_s30 + $0x10] sm:$0xff] %v645_v3   ;;  %v655_v11 = vpack.c.bf16 %v414_v10, %v413_v9  ;;  %v383_v12 = vmul.f32 %v849_v38, %v826_v28  ;;  %v384_v13 = vmul.f32 %v849_v38, %v828_v29  ;;  %vm349_vm12 = vcmp.ge.f32.partialorder %v830_v30, 0.0 }
  0x31   : > { %729 = vst [vmem:[%s884_s30 + $0x18] sm:$0xff] %v650_v6   ;;  %vm350_vm13 = vcmp.ge.f32.partialorder %v832_v31, 0.0  ;;  %v385_v14 = vmul.f32 %v849_v38, %v830_v30  ;;  %v386_v15 = vmul.f32 %v849_v38, %v832_v31  ;;  %vm351_vm14 = vcmp.ge.f32.partialorder %v834_v32, 0.0 }
  0x32   : > { %730 = vst [vmem:[%s884_s30 + $0x20] sm:$0xff] %v655_v11   ;;  %v415_v16 = vsel %vm347_vm10, %v826_v28, %v383_v12  ;;  %v416_v17 = vsel %vm348_vm11, %v828_v29, %v384_v13  ;;  %vm352_vm15 = vcmp.ge.f32.partialorder %v836_v33, 0.0  ;;  %v387_v18 = vmul.f32 %v849_v38, %v834_v32 }
  0x33   : > { %v660_v19 = vpack.c.bf16 %v416_v17, %v415_v16  ;;  %v417_v20 = vsel %vm349_vm12, %v830_v30, %v385_v14  ;;  %v418_v21 = vsel %vm350_vm13, %v832_v31, %v386_v15  ;;  %v388_v22 = vmul.f32 %v849_v38, %v836_v33 }
  0x34   : > { %v665_v23 = vpack.c.bf16 %v418_v21, %v417_v20  ;;  %v419_v24 = vsel %vm351_vm14, %v834_v32, %v387_v18  ;;  %vm353_vm0 = vcmp.ge.f32.partialorder %v838_v34, 0.0  ;;  %vm354_vm1 = vcmp.ge.f32.partialorder %v840_v35, 0.0 }
  0x35   : > { %731 = vst [vmem:[%s884_s30 + $0x28] sm:$0xff] %v660_v19   ;;  %v420_v25 = vsel %vm352_vm15, %v836_v33, %v388_v22  ;;  %v389_v26 = vmul.f32 %v849_v38, %v838_v34  ;;  %v390_v27 = vmul.f32 %v849_v38, %v840_v35  ;;  %vm355_vm2 = vcmp.ge.f32.partialorder %v842_v36, 0.0 }
  0x36   : > { %732 = vst [vmem:[%s884_s30 + $0x30] sm:$0xff] %v665_v23   ;;  %v670_v28 = vpack.c.bf16 %v420_v25, %v419_v24  ;;  %vm356_vm3 = vcmp.ge.f32.partialorder %v844_v37, 0.0  ;;  %v391_v29 = vmul.f32 %v849_v38, %v842_v36  ;;  %v392_v30 = vmul.f32 %v849_v38, %v844_v37 }
  0x37   : > { %v421_v31 = vsel %vm353_vm0, %v838_v34, %v389_v26  ;;  %v422_v32 = vsel %vm354_vm1, %v840_v35, %v390_v27  ;;  %vm357_vm4 = vcmp.ge.f32.partialorder %v851_v39, 0.0  ;;  %vm358_vm5 = vcmp.ge.f32.partialorder %v853_v40, 0.0 }
  0x38   : > { %733 = vst [vmem:[%s884_s30 + $0x38] sm:$0xff] %v670_v28   ;;  %v675_v33 = vpack.c.bf16 %v422_v32, %v421_v31  ;;  %v423_v51 = vsel %vm355_vm2, %v842_v36, %v391_v29  ;;  %v424_v52 = vsel %vm356_vm3, %v844_v37, %v392_v30  ;;  %v393_v53 = vmul.f32 %v849_v38, %v851_v39 }
  0x39   : > { %v680_v54 = vpack.c.bf16 %v424_v52, %v423_v51  ;;  %v394_v34 = vmul.f32 %v849_v38, %v853_v40  ;;  %vm359_vm6 = vcmp.ge.f32.partialorder %v855_v41, 0.0  ;;  %vm360_vm7 = vcmp.ge.f32.partialorder %v857_v42, 0.0 }
  0x3a   : > { %734 = vst [vmem:[%s884_s30 + $0x40] sm:$0xff] %v675_v33   ;;  %v425_v35 = vsel %vm357_vm4, %v851_v39, %v393_v53  ;;  %v395_v55 = vmul.f32 %v849_v38, %v855_v41  ;;  %v396_v36 = vmul.f32 %v849_v38, %v857_v42  ;;  %vm361_vm8 = vcmp.ge.f32.partialorder %v859_v43, 0.0 }
  0x3b   : > { %735 = vst [vmem:[%s884_s30 + $0x48] sm:$0xff] %v680_v54   ;;  %v426_v37 = vsel %vm358_vm5, %v853_v40, %v394_v34  ;;  %vm362_vm9 = vcmp.ge.f32.partialorder %v861_v44, 0.0  ;;  %v397_v39 = vmul.f32 %v849_v38, %v859_v43  ;;  %v398_v56 = vmul.f32 %v849_v38, %v861_v44 }
  0x3c   : > { %v685_v57 = vpack.c.bf16 %v426_v37, %v425_v35  ;;  %v427_v58 = vsel %vm359_vm6, %v855_v41, %v395_v55  ;;  %v428_v59 = vsel %vm360_vm7, %v857_v42, %v396_v36  ;;  %vm363_vm10 = vcmp.ge.f32.partialorder %v863_v45, 0.0 }
  0x3d   : > { %v690_v60 = vpack.c.bf16 %v428_v59, %v427_v58  ;;  %v429_v40 = vsel %vm361_vm8, %v859_v43, %v397_v39  ;;  %v430_v61 = vsel %vm362_vm9, %v861_v44, %v398_v56  ;;  %vm364_vm11 = vcmp.ge.f32.partialorder %v865_v46, 0.0 }
  0x3e   : > { %736 = vst [vmem:[%s884_s30 + $0x50] sm:$0xff] %v685_v57   ;;  %v695_v62 = vpack.c.bf16 %v430_v61, %v429_v40  ;;  %v399_v63 = vmul.f32 %v849_v38, %v863_v45  ;;  %v400_v41 = vmul.f32 %v849_v38, %v865_v46  ;;  %vm365_vm12 = vcmp.ge.f32.partialorder %v867_v47, 0.0 }
  0x3f   : > { %737 = vst [vmem:[%s884_s30 + $0x58] sm:$0xff] %v690_v60   ;;  %vm366_vm13 = vcmp.ge.f32.partialorder %v869_v48, 0.0  ;;  %v401_v42 = vmul.f32 %v849_v38, %v867_v47  ;;  %v402_v43 = vmul.f32 %v849_v38, %v869_v48  ;;  %vm367_vm14 = vcmp.ge.f32.partialorder %v871_v49, 0.0 }
  0x40   : > { %738 = vst [vmem:[%s884_s30 + $0x60] sm:$0xff] %v695_v62   ;;  %v431_v44 = vsel %vm363_vm10, %v863_v45, %v399_v63  ;;  %v432_v0 = vsel %vm364_vm11, %v865_v46, %v400_v41  ;;  %vm368_vm15 = vcmp.ge.f32.partialorder %v873_v50, 0.0  ;;  %v403_v1 = vmul.f32 %v849_v38, %v871_v49 }
  0x41   : > { %v700_v2 = vpack.c.bf16 %v432_v0, %v431_v44  ;;  %v433_v7 = vsel %vm365_vm12, %v867_v47, %v401_v42  ;;  %v434_v8 = vsel %vm366_vm13, %v869_v48, %v402_v43  ;;  %v404_v3 = vmul.f32 %v849_v38, %v873_v50 }
  0x42   : > { %v705_v4 = vpack.c.bf16 %v434_v8, %v433_v7  ;;  %v435_v5 = vsel %vm367_vm14, %v871_v49, %v403_v1 }
  0x43   : > { %739 = vst [vmem:[%s884_s30 + $0x68] sm:$0xff] %v700_v2   ;;  %v436_v45 = vsel %vm368_vm15, %v873_v50, %v404_v3 }
  0x44   : > { %740 = vst [vmem:[%s884_s30 + $0x70] sm:$0xff] %v705_v4   ;;  %v710_v46 = vpack.c.bf16 %v436_v45, %v435_v5 }
  0x46   : > { %741 = vst [vmem:[%s884_s30 + $0x78] sm:$0xff] %v710_v46  }
  0x47 PF: > { %s14_s15 = sadd.s32 1, %s759_s15  }
  0x48   : > { %p11_p4 = scmp.ge.s32.totalorder %s14_s15, 4  }
  0x4a   :  { %13 = sbr.rel (!%p11_p4) target bundleno = 1 (0x1), region = 66 }

</bundles_post_ra>
